<compile_context>
chip_gen: v6e
topology: v6e:2x2x1
jax: 0.10.0
libtpu: 0.0.40
codegen_flags: <defaults>
</compile_context>

<pallas_src>
import functools

import jax
import jax.numpy as jnp
from jax.experimental import pallas as pl
from jax.experimental.pallas import tpu as pltpu


def _round_up(x, m):
    return ((x + m - 1) // m) * m


def cvae_kernel(x_ref, c_ref, eps_ref,
                we1x_ref, we1cd_ref, be1_ref,
                we2_ref, be2_ref,
                wh_ref, bh_ref,
                wd1z_ref, wd1cd_ref, bd1_ref,
                wd2_ref, bd2_ref,
                wd3_ref, bd3_ref,
                out_ref,
                *, latent, out_dim):
    f32 = jnp.float32
    bf16 = jnp.bfloat16

    x = x_ref[...]          # (TB, feat) f32
    cb = c_ref[...]         # (TB, 1) f32 labels in {0., 1.}
    eps = eps_ref[...]      # (TB, latent) f32

    # ---------------- Encoder ----------------
    # one_hot(c, 2) @ W_c == W_c[0] + c*(W_c[1]-W_c[0]); W_c[0] is folded into
    # the bias at pack time, so only the delta row + one VPU multiply remain.
    e_cond = cb * we1cd_ref[...]                                   # (TB, hidden) f32
    h1 = jnp.dot(x.astype(bf16), we1x_ref[...], preferred_element_type=f32)
    h1 = jnp.maximum(h1 + e_cond + be1_ref[...], 0.0)              # Dropout = identity (eval)
    h2 = jnp.dot(h1.astype(bf16), we2_ref[...], preferred_element_type=f32)
    h2 = jnp.maximum(h2 + be2_ref[...], 0.0)                       # Dropout = identity (eval)

    # Fused [means | log_var] head: one matmul instead of two.
    heads = jnp.dot(h2.astype(bf16), wh_ref[...], preferred_element_type=f32) + bh_ref[...]
    means = heads[:, :latent]
    log_var = heads[:, latent:]

    # ---------------- Reparameterize (f32) ----------------
    z = means + eps * jnp.exp(0.5 * log_var)

    # ---------------- Decoder ----------------
    d_cond = cb * wd1cd_ref[...]
    d1 = jnp.dot(z.astype(bf16), wd1z_ref[...], preferred_element_type=f32)
    d1 = jnp.maximum(d1 + d_cond + bd1_ref[...], 0.0)              # Dropout = identity (eval)
    d2 = jnp.dot(d1.astype(bf16), wd2_ref[...], preferred_element_type=f32)
    d2 = jnp.maximum(d2 + bd2_ref[...], 0.0)                       # Dropout = identity (eval)
    recon = jax.nn.sigmoid(
        jnp.dot(d2.astype(bf16), wd3_ref[...], preferred_element_type=f32) + bd3_ref[...])

    # ---------------- Packed output: store only the valid lanes ----------------
    # [recon | means | log_var | z]; pad lanes of the (TB, 128) block are left
    # untouched (garbage) and discarded by the wrapper.
    valid = out_dim + 3 * latent
    out_ref[:, :valid] = jnp.concatenate([recon, means, log_var, z], axis=-1)


def cvae_forward(x, c, eps, kparams):
    """Full CVAE forward (eval mode) in a single pallas_call.

    Returns (recon_x, means, log_var, z), matching CVAE.forward, with `eps`
    supplied by the caller (equivalent of torch.randn_like(std))."""
    B, feat = x.shape
    latent = kparams["wd1z"].shape[0]
    out_dim = kparams["wd3"].shape[1]
    valid = out_dim + 3 * latent
    pack_w = _round_up(valid, 128)       # lane-dense packed output width

    # Tiny-batch safeguard only (sublane minimum); normal batches stream unpadded.
    b_eff = B
    if B < 8:
        pad = 8 - B
        x = jnp.pad(x, ((0, pad), (0, 0)))
        c = jnp.pad(c, ((0, pad),))
        eps = jnp.pad(eps, ((0, pad), (0, 0)))
        b_eff = 8
    c_f = c.astype(jnp.float32)[:, None]                 # (B_eff, 1) in {0., 1.}

    # Batch tiling: up to 512 rows per grid step; for small/moderate batches
    # split into ~2 tiles so the "parallel" axis shards across both v7x TCs.
    tile_b = min(512, max(8, _round_up(pl.cdiv(b_eff, 2), 8)))
    grid = (pl.cdiv(b_eff, tile_b),)     # ragged last block handled by Pallas

    vmem = pltpu.MemorySpace.VMEM

    def batch_spec(cols):
        return pl.BlockSpec((tile_b, cols), lambda i: (i, 0), memory_space=vmem)

    def full_spec(arr):
        # Whole-array resident block (same block index every grid step).
        return pl.BlockSpec(arr.shape, lambda i: (0, 0), memory_space=vmem)

    w_order = ("we1x", "we1cd", "be1", "we2", "be2", "wh", "bh",
               "wd1z", "wd1cd", "bd1", "wd2", "bd2", "wd3", "bd3")
    weights = [kparams[k] for k in w_order]

    packed = pl.pallas_call(
        functools.partial(cvae_kernel, latent=latent, out_dim=out_dim),
        out_shape=jax.ShapeDtypeStruct((b_eff, pack_w), jnp.float32),
        grid=grid,
        in_specs=[batch_spec(feat), batch_spec(1), batch_spec(latent)]
                 + [full_spec(w) for w in weights],
        out_specs=pl.BlockSpec((tile_b, pack_w), lambda i: (i, 0), memory_space=vmem),
        compiler_params=pltpu.CompilerParams(dimension_semantics=("parallel",)),
    )(x, c_f, eps, *weights)

    packed = packed[:B]
    recon_x = packed[:, :out_dim]
    means = packed[:, out_dim:out_dim + latent]
    log_var = packed[:, out_dim + latent:out_dim + 2 * latent]
    z = packed[:, out_dim + 2 * latent:out_dim + 3 * latent]
    return recon_x, means, log_var, z


def init_params(key, feat, hidden, latent, out_dim, num_labels=2):
    """PyTorch-default-like init; weights stored as (in_features, out_features)."""
    def linear(k, fan_in, fan_out):
        kw, kb = jax.random.split(k)
        bound = 1.0 / jnp.sqrt(fan_in)
        w = jax.random.uniform(kw, (fan_in, fan_out), jnp.float32, -bound, bound)
        b = jax.random.uniform(kb, (1, fan_out), jnp.float32, -bound, bound)
        return w, b

    keys = jax.random.split(key, 7)
    we1, be1 = linear(keys[0], feat + num_labels, hidden)    # Encoder.L0
    we2, be2 = linear(keys[1], hidden, hidden)               # Encoder.L1
    wm, bm = linear(keys[2], hidden, latent)                 # linear_means
    wv, bv = linear(keys[3], hidden, latent)                 # linear_log_var
    wd1, bd1 = linear(keys[4], latent + num_labels, hidden)  # Decoder.L0
    wd2, bd2 = linear(keys[5], hidden, hidden)               # Decoder.L1
    wd3, bd3 = linear(keys[6], hidden, out_dim)              # Decoder.L2
    return dict(we1=we1, be1=be1, we2=we2, be2=be2, wm=wm, bm=bm, wv=wv, bv=bv,
                wd1=wd1, bd1=bd1, wd2=wd2, bd2=bd2, wd3=wd3, bd3=bd3)


def pack_params(p, feat, latent):
    """Kernel layout (mathematically identical to the reference for c in {0,1}):
      * split the conditional rows out of the L0 weights, fold the label-0 row
        into the bias and keep only the delta row (W[1]-W[0]),
      * fuse the two encoder heads into one (hidden, 2*latent) matmul,
      * cast all matmul weights to bf16 (MXU-native); biases / VPU-only rows
        stay f32."""
    bf16 = jnp.bfloat16
    we1, wd1 = p["we1"], p["wd1"]
    return dict(
        we1x=we1[:feat].astype(bf16),
        we1cd=(we1[feat + 1] - we1[feat])[None, :],            # delta row, f32 (VPU)
        be1=p["be1"] + we1[feat][None, :],                     # fold label-0 row into bias
        we2=p["we2"].astype(bf16), be2=p["be2"],
        wh=jnp.concatenate([p["wm"], p["wv"]], axis=1).astype(bf16),
        bh=jnp.concatenate([p["bm"], p["bv"]], axis=1),
        wd1z=wd1[:latent].astype(bf16),
        wd1cd=(wd1[latent + 1] - wd1[latent])[None, :],
        bd1=p["bd1"] + wd1[latent][None, :],
        wd2=p["wd2"].astype(bf16), bd2=p["bd2"],
        wd3=p["wd3"].astype(bf16), bd3=p["bd3"],
    )


def reference_forward(x, c, eps, p, *, num_labels=2):
    """Pure-JAX f32 reference mirroring the PyTorch CVAE.forward (eval mode)."""
    onehot = jax.nn.one_hot(c, num_labels, dtype=x.dtype)
    xe = jnp.concatenate([x, onehot], axis=-1)
    h1 = jnp.maximum(xe @ p["we1"] + p["be1"], 0.0)
    h2 = jnp.maximum(h1 @ p["we2"] + p["be2"], 0.0)
    means = h2 @ p["wm"] + p["bm"]
    log_var = h2 @ p["wv"] + p["bv"]
    z = means + eps * jnp.exp(0.5 * log_var)
    zd = jnp.concatenate([z, onehot], axis=-1)
    d1 = jnp.maximum(zd @ p["wd1"] + p["bd1"], 0.0)
    d2 = jnp.maximum(d1 @ p["wd2"] + p["bd2"], 0.0)
    recon = jax.nn.sigmoid(d2 @ p["wd3"] + p["bd3"])
    return recon, means, log_var, z


if __name__ == "__main__":
    # CVAE(encoder_layer_sizes=[32, 64], latent_size=16,
    #      decoder_layer_sizes=[64, 32], conditional=True, num_labels=2)
    B, feat, hidden, latent, out_dim, num_labels = 16, 32, 64, 16, 32, 2

    key = jax.random.PRNGKey(0)
    kx, kc, ke, kp = jax.random.split(key, 4)
    x = jax.random.normal(kx, (B, feat), dtype=jnp.float32)
    c = jax.random.randint(kc, (B,), 0, num_labels, dtype=jnp.int32)
    eps = jax.random.normal(ke, (B, latent), dtype=jnp.float32)  # ~ randn_like(std)

    params = init_params(kp, feat, hidden, latent, out_dim, num_labels)
    kparams = pack_params(params, feat, latent)

    recon_x, means, log_var, z = cvae_forward(x, c, eps, kparams)
    jax.block_until_ready((recon_x, means, log_var, z))

    # Reference is pure f32; the kernel uses bf16 matmul operands (f32 accum),
    # so compare with a loosened tolerance.
    ref = reference_forward(x, c, eps, params, num_labels=num_labels)
    for name, got, want in zip(("recon_x", "means", "log_var", "z"),
                               (recon_x, means, log_var, z), ref):
        assert got.shape == want.shape, (name, got.shape, want.shape)
        assert jnp.allclose(got, want, atol=5e-2, rtol=5e-2), (
            name, float(jnp.max(jnp.abs(got - want))))

    assert recon_x.shape == (B, out_dim) and z.shape == (B, latent)
    print("KERNEL_OK")
</pallas_src>

<mosaic_0001>
module attributes {stable_mosaic.version = 11 : i64} {
  func.func @cvae_kernel(%arg0: i32, %arg1: memref<8x32xf32, #tpu.memory_space<vmem>>, %arg2: memref<8x1xf32, #tpu.memory_space<vmem>>, %arg3: memref<8x16xf32, #tpu.memory_space<vmem>>, %arg4: memref<32x64xbf16, #tpu.memory_space<vmem>>, %arg5: memref<1x64xf32, #tpu.memory_space<vmem>>, %arg6: memref<1x64xf32, #tpu.memory_space<vmem>>, %arg7: memref<64x64xbf16, #tpu.memory_space<vmem>>, %arg8: memref<1x64xf32, #tpu.memory_space<vmem>>, %arg9: memref<64x32xbf16, #tpu.memory_space<vmem>>, %arg10: memref<1x32xf32, #tpu.memory_space<vmem>>, %arg11: memref<16x64xbf16, #tpu.memory_space<vmem>>, %arg12: memref<1x64xf32, #tpu.memory_space<vmem>>, %arg13: memref<1x64xf32, #tpu.memory_space<vmem>>, %arg14: memref<64x64xbf16, #tpu.memory_space<vmem>>, %arg15: memref<1x64xf32, #tpu.memory_space<vmem>>, %arg16: memref<64x32xbf16, #tpu.memory_space<vmem>>, %arg17: memref<1x32xf32, #tpu.memory_space<vmem>>, %arg18: memref<8x128xf32, #tpu.memory_space<vmem>>) attributes {dimension_semantics = [#tpu.dimension_semantics<parallel>], iteration_bounds = array<i64: 2>, scalar_prefetch = 0 : i64, scratch_operands = 0 : i64, tpu.core_type = #tpu.core_type<tc>, window_params = [{transform_indices = @transform_0, window_bounds = array<i64: 8, 32>}, {transform_indices = @transform_1, window_bounds = array<i64: 8, 1>}, {transform_indices = @transform_2, window_bounds = array<i64: 8, 16>}, {pipeline_mode = #tpu.pipeline_mode<synchronous>, transform_indices = @transform_3, window_bounds = array<i64: 32, 64>}, {pipeline_mode = #tpu.pipeline_mode<synchronous>, transform_indices = @transform_4, window_bounds = array<i64: 1, 64>}, {pipeline_mode = #tpu.pipeline_mode<synchronous>, transform_indices = @transform_5, window_bounds = array<i64: 1, 64>}, {pipeline_mode = #tpu.pipeline_mode<synchronous>, transform_indices = @transform_6, window_bounds = array<i64: 64, 64>}, {pipeline_mode = #tpu.pipeline_mode<synchronous>, transform_indices = @transform_7, window_bounds = array<i64: 1, 64>}, {pipeline_mode = #tpu.pipeline_mode<synchronous>, transform_indices = @transform_8, window_bounds = array<i64: 64, 32>}, {pipeline_mode = #tpu.pipeline_mode<synchronous>, transform_indices = @transform_9, window_bounds = array<i64: 1, 32>}, {pipeline_mode = #tpu.pipeline_mode<synchronous>, transform_indices = @transform_10, window_bounds = array<i64: 16, 64>}, {pipeline_mode = #tpu.pipeline_mode<synchronous>, transform_indices = @transform_11, window_bounds = array<i64: 1, 64>}, {pipeline_mode = #tpu.pipeline_mode<synchronous>, transform_indices = @transform_12, window_bounds = array<i64: 1, 64>}, {pipeline_mode = #tpu.pipeline_mode<synchronous>, transform_indices = @transform_13, window_bounds = array<i64: 64, 64>}, {pipeline_mode = #tpu.pipeline_mode<synchronous>, transform_indices = @transform_14, window_bounds = array<i64: 1, 64>}, {pipeline_mode = #tpu.pipeline_mode<synchronous>, transform_indices = @transform_15, window_bounds = array<i64: 64, 32>}, {pipeline_mode = #tpu.pipeline_mode<synchronous>, transform_indices = @transform_16, window_bounds = array<i64: 1, 32>}, {transform_indices = @transform_17, window_bounds = array<i64: 8, 128>}]} {
    %c0 = arith.constant 0 : index
    %c0_0 = arith.constant 0 : index
    %0 = vector.load %arg1[%c0, %c0_0] : memref<8x32xf32, #tpu.memory_space<vmem>>, vector<8x32xf32>
    %c0_1 = arith.constant 0 : index
    %c0_2 = arith.constant 0 : index
    %1 = vector.load %arg2[%c0_1, %c0_2] : memref<8x1xf32, #tpu.memory_space<vmem>>, vector<8x1xf32>
    %c0_3 = arith.constant 0 : index
    %c0_4 = arith.constant 0 : index
    %2 = vector.load %arg3[%c0_3, %c0_4] : memref<8x16xf32, #tpu.memory_space<vmem>>, vector<8x16xf32>
    %c0_5 = arith.constant 0 : index
    %c0_6 = arith.constant 0 : index
    %3 = vector.load %arg5[%c0_5, %c0_6] : memref<1x64xf32, #tpu.memory_space<vmem>>, vector<1x64xf32>
    %4 = vector.broadcast %1 : vector<8x1xf32> to vector<8x64xf32>
    %5 = vector.broadcast %3 : vector<1x64xf32> to vector<8x64xf32>
    %6 = arith.mulf %4, %5 : vector<8x64xf32>
    %7 = arith.truncf %0 : vector<8x32xf32> to vector<8x32xbf16>
    %c0_7 = arith.constant 0 : index
    %c0_8 = arith.constant 0 : index
    %8 = vector.load %arg4[%c0_7, %c0_8] : memref<32x64xbf16, #tpu.memory_space<vmem>>, vector<32x64xbf16>
    %cst = arith.constant dense<0.000000e+00> : vector<8x64xf32>
    %9 = tpu.matmul %7, %8, %cst {dimension_numbers = #tpu.dot_dimension_numbers<[1], [0], [0], [1], [0, 0, 1, 1], [], []>} : vector<8x32xbf16>, vector<32x64xbf16>, vector<8x64xf32> -> vector<8x64xf32>
    %10 = arith.addf %9, %6 : vector<8x64xf32>
    %c0_9 = arith.constant 0 : index
    %c0_10 = arith.constant 0 : index
    %11 = vector.load %arg6[%c0_9, %c0_10] : memref<1x64xf32, #tpu.memory_space<vmem>>, vector<1x64xf32>
    %12 = vector.broadcast %11 : vector<1x64xf32> to vector<8x64xf32>
    %13 = arith.addf %10, %12 : vector<8x64xf32>
    %cst_11 = arith.constant 0.000000e+00 : f32
    %14 = vector.broadcast %cst_11 : f32 to vector<8x64xf32>
    %15 = arith.maximumf %13, %14 : vector<8x64xf32>
    %16 = arith.truncf %15 : vector<8x64xf32> to vector<8x64xbf16>
    %c0_12 = arith.constant 0 : index
    %c0_13 = arith.constant 0 : index
    %17 = vector.load %arg7[%c0_12, %c0_13] : memref<64x64xbf16, #tpu.memory_space<vmem>>, vector<64x64xbf16>
    %cst_14 = arith.constant dense<0.000000e+00> : vector<8x64xf32>
    %18 = tpu.matmul %16, %17, %cst_14 {dimension_numbers = #tpu.dot_dimension_numbers<[1], [0], [0], [1], [0, 0, 1, 1], [], []>} : vector<8x64xbf16>, vector<64x64xbf16>, vector<8x64xf32> -> vector<8x64xf32>
    %c0_15 = arith.constant 0 : index
    %c0_16 = arith.constant 0 : index
    %19 = vector.load %arg8[%c0_15, %c0_16] : memref<1x64xf32, #tpu.memory_space<vmem>>, vector<1x64xf32>
    %20 = vector.broadcast %19 : vector<1x64xf32> to vector<8x64xf32>
    %21 = arith.addf %18, %20 : vector<8x64xf32>
    %cst_17 = arith.constant 0.000000e+00 : f32
    %22 = vector.broadcast %cst_17 : f32 to vector<8x64xf32>
    %23 = arith.maximumf %21, %22 : vector<8x64xf32>
    %24 = arith.truncf %23 : vector<8x64xf32> to vector<8x64xbf16>
    %c0_18 = arith.constant 0 : index
    %c0_19 = arith.constant 0 : index
    %25 = vector.load %arg9[%c0_18, %c0_19] : memref<64x32xbf16, #tpu.memory_space<vmem>>, vector<64x32xbf16>
    %cst_20 = arith.constant dense<0.000000e+00> : vector<8x32xf32>
    %26 = tpu.matmul %24, %25, %cst_20 {dimension_numbers = #tpu.dot_dimension_numbers<[1], [0], [0], [1], [0, 0, 1, 1], [], []>} : vector<8x64xbf16>, vector<64x32xbf16>, vector<8x32xf32> -> vector<8x32xf32>
    %c0_21 = arith.constant 0 : index
    %c0_22 = arith.constant 0 : index
    %27 = vector.load %arg10[%c0_21, %c0_22] : memref<1x32xf32, #tpu.memory_space<vmem>>, vector<1x32xf32>
    %28 = vector.broadcast %27 : vector<1x32xf32> to vector<8x32xf32>
    %29 = arith.addf %26, %28 : vector<8x32xf32>
    %30 = vector.extract_strided_slice %29 {offsets = [0, 0], sizes = [8, 16], strides = [1, 1]} : vector<8x32xf32> to vector<8x16xf32>
    %31 = vector.extract_strided_slice %29 {offsets = [0, 16], sizes = [8, 16], strides = [1, 1]} : vector<8x32xf32> to vector<8x16xf32>
    %cst_23 = arith.constant 5.000000e-01 : f32
    %32 = vector.broadcast %cst_23 : f32 to vector<8x16xf32>
    %33 = arith.mulf %32, %31 : vector<8x16xf32>
    %34 = math.exp %33 : vector<8x16xf32>
    %35 = arith.mulf %2, %34 : vector<8x16xf32>
    %36 = arith.addf %30, %35 : vector<8x16xf32>
    %c0_24 = arith.constant 0 : index
    %c0_25 = arith.constant 0 : index
    %37 = vector.load %arg12[%c0_24, %c0_25] : memref<1x64xf32, #tpu.memory_space<vmem>>, vector<1x64xf32>
    %38 = vector.broadcast %1 : vector<8x1xf32> to vector<8x64xf32>
    %39 = vector.broadcast %37 : vector<1x64xf32> to vector<8x64xf32>
    %40 = arith.mulf %38, %39 : vector<8x64xf32>
    %41 = arith.truncf %36 : vector<8x16xf32> to vector<8x16xbf16>
    %c0_26 = arith.constant 0 : index
    %c0_27 = arith.constant 0 : index
    %42 = vector.load %arg11[%c0_26, %c0_27] : memref<16x64xbf16, #tpu.memory_space<vmem>>, vector<16x64xbf16>
    %cst_28 = arith.constant dense<0.000000e+00> : vector<8x64xf32>
    %43 = tpu.matmul %41, %42, %cst_28 {dimension_numbers = #tpu.dot_dimension_numbers<[1], [0], [0], [1], [0, 0, 1, 1], [], []>} : vector<8x16xbf16>, vector<16x64xbf16>, vector<8x64xf32> -> vector<8x64xf32>
    %44 = arith.addf %43, %40 : vector<8x64xf32>
    %c0_29 = arith.constant 0 : index
    %c0_30 = arith.constant 0 : index
    %45 = vector.load %arg13[%c0_29, %c0_30] : memref<1x64xf32, #tpu.memory_space<vmem>>, vector<1x64xf32>
    %46 = vector.broadcast %45 : vector<1x64xf32> to vector<8x64xf32>
    %47 = arith.addf %44, %46 : vector<8x64xf32>
    %cst_31 = arith.constant 0.000000e+00 : f32
    %48 = vector.broadcast %cst_31 : f32 to vector<8x64xf32>
    %49 = arith.maximumf %47, %48 : vector<8x64xf32>
    %50 = arith.truncf %49 : vector<8x64xf32> to vector<8x64xbf16>
    %c0_32 = arith.constant 0 : index
    %c0_33 = arith.constant 0 : index
    %51 = vector.load %arg14[%c0_32, %c0_33] : memref<64x64xbf16, #tpu.memory_space<vmem>>, vector<64x64xbf16>
    %cst_34 = arith.constant dense<0.000000e+00> : vector<8x64xf32>
    %52 = tpu.matmul %50, %51, %cst_34 {dimension_numbers = #tpu.dot_dimension_numbers<[1], [0], [0], [1], [0, 0, 1, 1], [], []>} : vector<8x64xbf16>, vector<64x64xbf16>, vector<8x64xf32> -> vector<8x64xf32>
    %c0_35 = arith.constant 0 : index
    %c0_36 = arith.constant 0 : index
    %53 = vector.load %arg15[%c0_35, %c0_36] : memref<1x64xf32, #tpu.memory_space<vmem>>, vector<1x64xf32>
    %54 = vector.broadcast %53 : vector<1x64xf32> to vector<8x64xf32>
    %55 = arith.addf %52, %54 : vector<8x64xf32>
    %cst_37 = arith.constant 0.000000e+00 : f32
    %56 = vector.broadcast %cst_37 : f32 to vector<8x64xf32>
    %57 = arith.maximumf %55, %56 : vector<8x64xf32>
    %58 = arith.truncf %57 : vector<8x64xf32> to vector<8x64xbf16>
    %c0_38 = arith.constant 0 : index
    %c0_39 = arith.constant 0 : index
    %59 = vector.load %arg16[%c0_38, %c0_39] : memref<64x32xbf16, #tpu.memory_space<vmem>>, vector<64x32xbf16>
    %cst_40 = arith.constant dense<0.000000e+00> : vector<8x32xf32>
    %60 = tpu.matmul %58, %59, %cst_40 {dimension_numbers = #tpu.dot_dimension_numbers<[1], [0], [0], [1], [0, 0, 1, 1], [], []>} : vector<8x64xbf16>, vector<64x32xbf16>, vector<8x32xf32> -> vector<8x32xf32>
    %c0_41 = arith.constant 0 : index
    %c0_42 = arith.constant 0 : index
    %61 = vector.load %arg17[%c0_41, %c0_42] : memref<1x32xf32, #tpu.memory_space<vmem>>, vector<1x32xf32>
    %62 = vector.broadcast %61 : vector<1x32xf32> to vector<8x32xf32>
    %63 = arith.addf %60, %62 : vector<8x32xf32>
    %64 = arith.negf %63 : vector<8x32xf32>
    %65 = math.exp %64 : vector<8x32xf32>
    %cst_43 = arith.constant 1.000000e+00 : f32
    %66 = vector.broadcast %cst_43 : f32 to vector<8x32xf32>
    %67 = arith.addf %66, %65 : vector<8x32xf32>
    %68 = arith.divf %66, %67 : vector<8x32xf32>
    %69 = tpu.concatenate %68, %30, %31, %36 in 1 : vector<8x32xf32>, vector<8x16xf32>, vector<8x16xf32>, vector<8x16xf32> -> vector<8x80xf32>
    %c0_44 = arith.constant 0 : index
    %c0_45 = arith.constant 0 : index
    %70 = vector.load %arg18[%c0_44, %c0_45] : memref<8x128xf32, #tpu.memory_space<vmem>>, vector<8x80xf32>
    tpu.vector_store %arg18[%c0_44, %c0_45], %69 {strides = array<i32>} : memref<8x128xf32, #tpu.memory_space<vmem>>, vector<8x80xf32>,
    return
  }
  func.func @transform_0(%arg0: i32) -> (i32, i32) {
    %c0_i32 = arith.constant 0 : i32
    %c0_i32_0 = arith.constant 0 : i32
    return %arg0, %c0_i32 : i32, i32
  }
  func.func @transform_1(%arg0: i32) -> (i32, i32) {
    %c0_i32 = arith.constant 0 : i32
    %c0_i32_0 = arith.constant 0 : i32
    return %arg0, %c0_i32 : i32, i32
  }
  func.func @transform_2(%arg0: i32) -> (i32, i32) {
    %c0_i32 = arith.constant 0 : i32
    %c0_i32_0 = arith.constant 0 : i32
    return %arg0, %c0_i32 : i32, i32
  }
  func.func @transform_3(%arg0: i32) -> (i32, i32) {
    %c0_i32 = arith.constant 0 : i32
    %c0_i32_0 = arith.constant 0 : i32
    %c0_i32_1 = arith.constant 0 : i32
    return %c0_i32, %c0_i32_0 : i32, i32
  }
  func.func @transform_4(%arg0: i32) -> (i32, i32) {
    %c0_i32 = arith.constant 0 : i32
    %c0_i32_0 = arith.constant 0 : i32
    %c0_i32_1 = arith.constant 0 : i32
    return %c0_i32, %c0_i32_0 : i32, i32
  }
  func.func @transform_5(%arg0: i32) -> (i32, i32) {
    %c0_i32 = arith.constant 0 : i32
    %c0_i32_0 = arith.constant 0 : i32
    %c0_i32_1 = arith.constant 0 : i32
    return %c0_i32, %c0_i32_0 : i32, i32
  }
  func.func @transform_6(%arg0: i32) -> (i32, i32) {
    %c0_i32 = arith.constant 0 : i32
    %c0_i32_0 = arith.constant 0 : i32
    %c0_i32_1 = arith.constant 0 : i32
    return %c0_i32, %c0_i32_0 : i32, i32
  }
  func.func @transform_7(%arg0: i32) -> (i32, i32) {
    %c0_i32 = arith.constant 0 : i32
    %c0_i32_0 = arith.constant 0 : i32
    %c0_i32_1 = arith.constant 0 : i32
    return %c0_i32, %c0_i32_0 : i32, i32
  }
  func.func @transform_8(%arg0: i32) -> (i32, i32) {
    %c0_i32 = arith.constant 0 : i32
    %c0_i32_0 = arith.constant 0 : i32
    %c0_i32_1 = arith.constant 0 : i32
    return %c0_i32, %c0_i32_0 : i32, i32
  }
  func.func @transform_9(%arg0: i32) -> (i32, i32) {
    %c0_i32 = arith.constant 0 : i32
    %c0_i32_0 = arith.constant 0 : i32
    %c0_i32_1 = arith.constant 0 : i32
    return %c0_i32, %c0_i32_0 : i32, i32
  }
  func.func @transform_10(%arg0: i32) -> (i32, i32) {
    %c0_i32 = arith.constant 0 : i32
    %c0_i32_0 = arith.constant 0 : i32
    %c0_i32_1 = arith.constant 0 : i32
    return %c0_i32, %c0_i32_0 : i32, i32
  }
  func.func @transform_11(%arg0: i32) -> (i32, i32) {
    %c0_i32 = arith.constant 0 : i32
    %c0_i32_0 = arith.constant 0 : i32
    %c0_i32_1 = arith.constant 0 : i32
    return %c0_i32, %c0_i32_0 : i32, i32
  }
  func.func @transform_12(%arg0: i32) -> (i32, i32) {
    %c0_i32 = arith.constant 0 : i32
    %c0_i32_0 = arith.constant 0 : i32
    %c0_i32_1 = arith.constant 0 : i32
    return %c0_i32, %c0_i32_0 : i32, i32
  }
  func.func @transform_13(%arg0: i32) -> (i32, i32) {
    %c0_i32 = arith.constant 0 : i32
    %c0_i32_0 = arith.constant 0 : i32
    %c0_i32_1 = arith.constant 0 : i32
    return %c0_i32, %c0_i32_0 : i32, i32
  }
  func.func @transform_14(%arg0: i32) -> (i32, i32) {
    %c0_i32 = arith.constant 0 : i32
    %c0_i32_0 = arith.constant 0 : i32
    %c0_i32_1 = arith.constant 0 : i32
    return %c0_i32, %c0_i32_0 : i32, i32
  }
  func.func @transform_15(%arg0: i32) -> (i32, i32) {
    %c0_i32 = arith.constant 0 : i32
    %c0_i32_0 = arith.constant 0 : i32
    %c0_i32_1 = arith.constant 0 : i32
    return %c0_i32, %c0_i32_0 : i32, i32
  }
  func.func @transform_16(%arg0: i32) -> (i32, i32) {
    %c0_i32 = arith.constant 0 : i32
    %c0_i32_0 = arith.constant 0 : i32
    %c0_i32_1 = arith.constant 0 : i32
    return %c0_i32, %c0_i32_0 : i32, i32
  }
  func.func @transform_17(%arg0: i32) -> (i32, i32) {
    %c0_i32 = arith.constant 0 : i32
    %c0_i32_0 = arith.constant 0 : i32
    return %arg0, %c0_i32 : i32, i32
  }
}

</mosaic_0001>

<bundles_post_ra>
// kernel: tpu_custom_call.1
= control target key start
LH: loop header
LB: loop body
LE: loop exit
PB: predicated region body
PF: predicated region fallthrough
CT: control target
= control target key end

     0   :  { %s1997_s0 = inlined_call_operand.vmem [shape: f32[16,32], index: 0, kind: input, shape index: {}]   ;;  %s1998_s1 = inlined_call_operand.vmem [shape: f32[16,1], index: 1, kind: input, shape index: {}]   ;;  %s1999_s2 = inlined_call_operand.hbm [shape: f32[16,16], index: 2, kind: input, shape index: {}]   ;;  %s2000_s3 = inlined_call_operand.hbm [shape: bf16[32,64], index: 3, kind: input, shape index: {}]   ;;  %s2001_s4 = inlined_call_operand.vmem [shape: f32[1,64], index: 4, kind: input, shape index: {}]   ;;  %s2002_s5 = inlined_call_operand.vmem [shape: f32[1,64], index: 5, kind: input, shape index: {}]   ;;  %s2003_s6 = inlined_call_operand.vmem [shape: bf16[64,64], index: 6, kind: input, shape index: {}]   ;;  %s2004_s7 = inlined_call_operand.vmem [shape: f32[1,64], index: 7, kind: input, shape index: {}]   ;;  %s2005_s8 = inlined_call_operand.vmem [shape: bf16[64,32], index: 8, kind: input, shape index: {}]   ;;  %s2006_s9 = inlined_call_operand.vmem [shape: f32[1,32], index: 9, kind: input, shape index: {}]   ;;  %s2007_s10 = inlined_call_operand.vmem [shape: bf16[16,64], index: 10, kind: input, shape index: {}]   ;;  %s2008_s11 = inlined_call_operand.vmem [shape: f32[1,64], index: 11, kind: input, shape index: {}]   ;;  %s2009_s12 = inlined_call_operand.vmem [shape: f32[1,64], index: 12, kind: input, shape index: {}]   ;;  %s2010_s13 = inlined_call_operand.vmem [shape: bf16[64,64], index: 13, kind: input, shape index: {}]   ;;  %s2011_s14 = inlined_call_operand.vmem [shape: f32[1,64], index: 14, kind: input, shape index: {}]   ;;  %s2012_s15 = inlined_call_operand.vmem [shape: bf16[64,32], index: 15, kind: input, shape index: {}]   ;;  %s2013_s16 = inlined_call_operand.vmem [shape: f32[1,32], index: 16, kind: input, shape index: {}]   ;;  %s2014_s17 = inlined_call_operand.hbm [shape: f32[16,128], index: 17, kind: output, shape index: {}]  }
   0x1   :  { %2024 = sst [smem:[#allocation15_spill]] %s1997_s0 }
   0x2   :  { %2025 = sst [smem:[#allocation16_spill]] %s1998_s1 }
   0x3   :  { %2026 = sst [smem:[#allocation17_spill]] %s2000_s3 }
   0x4   :  { %2027 = sst [smem:[#allocation18_spill]] %s2008_s11 }
   0x5   :  { %2028 = sst [smem:[#allocation19_spill]] %s2009_s12 }
   0x6   :  { %2029 = sst [smem:[#allocation20_spill]] %s2011_s14 }
   0x7   :  { %2030 = sst [smem:[#allocation21_spill]] %s2013_s16 }
   0x8   :  { %2031 = sst [smem:[#allocation22_spill]] %s2014_s17 }
   0x9   :  { %22 = vsyncpa [#allocation3], 0 }
   0xa   :  { %24 = vsyncpa [#allocation3 + $0x1], 0 }
   0xb   :  { %25 = vsyncpa [#allocation6], 0 }
   0xc   :  { %26 = vsyncpa [#allocation4], 0 }
   0xd   :  { %28 = vsyncpa [#allocation4 + $0x1], 0  ;;  %s1705_s24 = smov 0   ;;  %s1707_s25 = smov 0  }
   0xe   :  { %s1709_s26 = smov 0   ;;  %s1711_s27 = smov 0  }
   0xf LB: > { %2032 = sst [smem:[#allocation11_spill]] %s1590_s24  ;;  %s1726_s28 = sadd.s32 4294967295, %s1602_s27   ;;  %s1602_s27 = sphi %s1711_s27, %s2060_s27   ;;  %s1598_s26 = sphi %s1709_s26, %s2064_s26   ;;  %s1594_s25 = sphi %s1707_s25, %s2063_s25   ;;  %s1590_s24 = sphi %s1705_s24, %s2062_s24  }
  0x10   : > { %s1252_s29 = sadd.s32 4294967294, %s1602_s27   ;;  %p106_p0 = scmp.ne.s32.totalorder %s1594_s25, %s1590_s24 }
  0x11   : > { %p2020_p1 = scmp.eq.s32.totalorder %s1726_s28, 0  ;;  %p430_p3 = scmp.eq.s32.totalorder %s1252_s29, 1 }
  0x12   : > { %p1253_p5 = scmp.ge.s32.totalorder %s1602_s27, 1  ;;  %p437_p7 = scmp.lt.s32.totalorder %s1602_s27, 3 }
  0x13   : > { %p1735_p4 = por %p2020_p1, %p106_p0  ;;  %p1740_p6 = por %p430_p3, %p106_p0 }
  0x14   : > { %p1745_p8 = pnand %p1253_p5, %p437_p7  ;;  %s1604_s19 = smov [#allocation5]  }
  0x15   : > { %s2033_s0 = scalar_select %p1735_p4, 1, 0 }
  0x16   : > { %s2034_s30 = scalar_select %p1740_p6, 1, 0 }
  0x17   : > { %s2036_s18 = scalar_select %p1745_p8, 1, 0 }
  0x18   : > { %2035 = sst [smem:[#allocation12_spill]] %s2034_s30  ;;  %s449_s1 = sshll.u32 %s1604_s19, 4  ;;  %s450_s1 = int_to_ptr.vmem [resolvable:$true] %s449_s1 }
  0x19   : > { %p1397_p9 = pneg %p1745_p8  ;;  %s1759_s21 = sadd.s32 1, %s1602_s27  }
  0x1a   : > { %2038 = sst [smem:[#allocation13_spill]] %s1759_s21  ;;  %s93_s22 = sadd.s32 1, %s1598_s26 }
  0x1b   : > { %p1754_p11 = pnand %p1397_p9, %p2020_p1  ;;  %s90_s23 = ssub.s32 %s1602_s27, %s1759_s21 }
  0x1c   : > { %s1491_s29 = scalar_lea.vmem %s450_s1, 256  ;;  %p1499_p5 = scmp.lt.s32.totalorder %s450_s1, %s450_s1 }
  0x1d   : > { %p1482_p12 = pneg %p1754_p11  ;;  %p1492_p13 = scmp.ne.s32.totalorder %s450_s1, %s1491_s29 }
  0x1e   : > { %p1500_p7 = scmp.lt.s32.totalorder %s1491_s29, %s1491_s29 }
  0x1f   : > { %p1494_p0 = pnand %p1492_p13, %p1482_p12 }
  0x20   : > { %p1501_p10 = por %p1500_p7, %p1499_p5 }
  0x21   : > { %p1495_p3 = pneg %p1494_p0 }
  0x23   : > { %p1502_p2 = pnand %p1501_p10, %p1495_p3 }
  0x25   : > { %1505 = shalt.err (!%p1502_p2)
}
  0x26   : > { %s1605_s19 = smov 64   ;;  %s1606_s21 = smov 4  }
  0x27   : > { %s2039_s3 = sld [smem:[#allocation17_spill]]  ;;  %p91_p9 = scmp.eq.s32.totalorder %s90_s23, 0 }
  0x28   : > { %p100_p12 = scmp.ne.s32.totalorder %s1598_s26, %s1594_s25  ;;  %p101_p10 = scmp.eq.s32.totalorder %s1602_s27, 0 }
  0x29   : > { %p1410_p2 = scmp.lt.s32.totalorder %s1602_s27, 2  ;;  %p2041_p0 = scmp.eq.s32.totalorder %s1726_s28, 1 }
  0x2a   : > { %s1776_s29 = scalar_select %p91_p9, %s1598_s26, %s93_s22  }
  0x2b   : > { %p102_p13 = por %p101_p10, %p100_p12  ;;  %p1780_p3 = por %p2041_p0, %p100_p12 }
  0x2c   : > { %2040 = sst [smem:[#allocation14_spill]] %s1776_s29  ;;  %s516_s16 = sand.u32 1, %s1598_s26  }
  0x2d   : > { %1400 = dma.hbm_to_vmem [thread:$0]  (!%p1754_p11), %s2039_s3, 256, %s450_s1, [#allocation6], %s1605_s19, %s1605_s19, %s1606_s21  }
  0x2e   : > { %s2042_s17 = scalar_select %p1780_p3, 1, 0 }
  0x2f   : > { %s1257_s14 = sshll.u32 %s1602_s27, 7  ;;  %s1256_s12 = sshll.u32 %s516_s16, 3 }
  0x30   : > { %s1789_s24 = scalar_lea.hbm %s1999_s2, %s1257_s14  ;;  %s520_s30 = scalar_lea.vmem [#allocation2], %s1256_s12 }
  0x31   : > { %s527_s1 = sshll.u32 %s520_s30, 4  ;;  %p1791_p11 = pnand %p1410_p2, %p102_p13  ;;  %s528_s1 = int_to_ptr.vmem [resolvable:$true] %s527_s1 }
  0x32   : > { %s517_s22 = scalar_lea.sflag [#allocation3], %s516_s16  ;;  %s1506_s23 = scalar_lea.hbm %s1789_s24, 128 }
  0x33   : > { %p1507_p5 = scmp.ne.s32.totalorder %s1789_s24, %s1506_s23  ;;  %p1508_p7 = pneg %p1791_p11 }
  0x34   : > { %s1511_s19 = scalar_lea.hbm %s1999_s2, 256  ;;  %p1512_p10 = scmp.lt.s32.totalorder %s1789_s24, %s1999_s2 }
  0x35   : > { %p1509_p9 = pnand %p1508_p7, %p1507_p5  ;;  %p1513_p2 = scmp.lt.s32.totalorder %s1511_s19, %s1506_s23 }
  0x37   : > { %p1510_p12 = pneg %p1509_p9  ;;  %p1514_p13 = por %p1513_p2, %p1512_p10 }
  0x39   : > { %p1515_p0 = pnand %p1514_p13, %p1510_p12 }
  0x3b   : > { %1518 = shalt.err (!%p1515_p0)
}
  0x3c   : > { %s1519_s30 = scalar_lea.vmem %s528_s1, 128  ;;  %s1607_s16 = smov [#allocation2]  }
  0x3d   : > { %p1520_p1 = scmp.ne.s32.totalorder %s528_s1, %s1519_s30  ;;  %s1524_s3 = sshll.u32 %s1607_s16, 4  ;;  %s1525_s3 = int_to_ptr.vmem [resolvable:$false] %s1524_s3 }
  0x3e   : > { %s1526_s29 = scalar_lea.vmem %s1525_s3, 256  ;;  %p1527_p5 = scmp.lt.s32.totalorder %s528_s1, %s1525_s3 }
  0x3f   : > { %p1522_p6 = pnand %p1520_p1, %p1508_p7  ;;  %p1528_p9 = scmp.lt.s32.totalorder %s1526_s29, %s1519_s30 }
  0x41   : > { %p1523_p3 = pneg %p1522_p6  ;;  %p1529_p4 = por %p1528_p9, %p1527_p5 }
  0x43   : > { %p1530_p8 = pnand %p1529_p4, %p1523_p3 }
  0x45   : > { %1533 = shalt.err (!%p1530_p8)
}
  0x46   : > { %1404 = dma.hbm_to_vmem [thread:$0]  (!%p1791_p11), %s1789_s24, 128, %s528_s1, %s517_s22  }
  0x47   : > { %p2044_p12 = scmp.ne.s32.totalorder %s2036_s18, 0 }
  0x48   : > { %s1812_s23 = sand.u32 (!%p2044_p12), 1, %s1594_s25   ;;  %p2045_p1 = scmp.ne.s32.totalorder (!%p2044_p12), %s2033_s0, 0 }
  0x49   : > { %536 = sbr.rel (%p2044_p12) target bundleno = 1469 (0x5bd), region = 88  ;;  %s1259_s11 = sshll.u32 (!%p2044_p12), %s1812_s23, 3 }
  0x4a   : > { %s539_s3 = scalar_lea.sflag (!%p2044_p12), [#allocation3], %s1812_s23  ;;  %s1818_s29 = scalar_lea.vmem (!%p2044_p12), [#allocation2], %s1259_s11 }
  0x4e   : > { %1577 = dma.done.wait (%p2045_p1), %s539_s3, 128  }
  0x4f   : > { %1579 = vsyncadd (%p2045_p1), %s539_s3, 4294967168  ;;  %p2046_p4 = scmp.eq.s32.totalorder %s1726_s28, 0 }
  0x51   : > { %1581 = dma.done.wait (%p2046_p4), [#allocation6], 256   ;;  %p2047_p6 = pmov %p2046_p4 }
  0x52   : > { %p605_p8 = scmp.lt.s32.totalorder %s1726_s28, 1  ;;  %v1608_v0 = vmov 0.0   ;;  %vm1609_vm0 = vmmov 0   ;;  %v1610_v1 = vmov 0   ;;  %s2048_s21 = sld [smem:[#allocation15_spill]]  ;;  %v1455_v2 = vld [vmem:[#allocation5 + $0x8] sm:$0xff]  }
  0x53   : > { %1583 = vsyncadd (%p2047_p6), [#allocation6], 4294967040  ;;  %1327 = vmatprep.subr.bf16.mxu0 %v1608_v0  ;;  %1331 = vmatprep.mubr.msk.bf16.mxu0 %vm1609_vm0, %v1608_v0  ;;  %s2049_s20 = sld [smem:[#allocation16_spill]]  ;;  %v1456_v3 = vld [vmem:[#allocation5] sm:$0xff]   ;;  %v1457_v6 = vld [vmem:[%s2003_s6 + $0x18] sm:$0xff]   ;;  %vm647_vm1 = vcmask 261120  }
  0x54   : > { %s606_s18 = scalar_select %p605_p8, %s1726_s28, 1  ;;  %1454 = vset.pattern.permute.xlu0 %v1610_v1  ;;  %1335 = vmatprep.subr.bf16.mxu1 %v1608_v0  ;;  %v1458_v8 = vld [vmem:[%s2003_s6 + $0x10] sm:$0xff]   ;;  %v1459_v9 = vld [vmem:[%s2003_s6 + $0x8] sm:$0xff]   ;;  %v1460_v10 = vld [vmem:[%s2003_s6] sm:$0xff]   ;;  %vm740_vm2 = vcmask 523264   ;;  %vm894_vm3 = vcmask 130048  }
  0x55   : > { %1343 = vmatprep.mubr.msk.bf16.mxu1 %vm1609_vm0, %v1608_v0  ;;  %1328 = vmatpush3.bf16.msra.mxu0 %v1455_v2  ;;  %v1461_v11 = vld [vmem:[%s2005_s8 + $0x18] sm:$0xff]   ;;  %v1462_v12 = vld [vmem:[%s2005_s8 + $0x10] sm:$0xff]   ;;  %v1264_v13 = vld [vmem:[%s2001_s4] ss:$0 sm:$0xff]  ;;  %s1611_s30 = smov 32   ;;  %s1612_s16 = smov 112  }
  0x56   : > { %s1262_s0 = sshll.u32 %s606_s18, 3  ;;  %1329 = vmatprep.subr.bf16.mxu0 %v1608_v0  ;;  %1336 = vmatpush3.bf16.msra.mxu1 %v1457_v6  ;;  %v1268_v17 = vld [vmem:[%s2002_s5] ss:$0 sm:$0xff]  ;;  %v1463_v25 = vld [vmem:[%s2005_s8 + $0x8] sm:$0xff]   ;;  %v1466_v45 = vld [vmem:[%s2010_s13 + $0x18] sm:$0xff]   ;;  %s1613_s1 = smov 64  }
  0x57   : > { %1337 = vmatprep.subr.bf16.mxu1 %v1608_v0  ;;  %v1464_v26 = vld [vmem:[%s2005_s8] sm:$0xff]   ;;  %v1467_v46 = vld [vmem:[%s2010_s13 + $0x10] sm:$0xff]   ;;  %v1468_v52 = vld [vmem:[%s2010_s13 + $0x8] sm:$0xff]   ;;  %s2050_s18 = sld [smem:[#allocation18_spill]]  ;;  %vm1129_vm4 = vcmask 392192   ;;  %vm1132_vm5 = vcmask 654336  }
  0x58   : > { %s608_s22 = scalar_lea.vmem %s2048_s21, %s1262_s0  ;;  %v1269_v27 = vld [vmem:[%s2004_s7] ss:$0 sm:$0xff]  ;;  %v1470_v54 = vld [vmem:[%s2012_s15 + $0x18] sm:$0xff]   ;;  %v1471_v55 = vld [vmem:[%s2012_s15 + $0x10] sm:$0xff]   ;;  %s2053_s3 = sld [smem:[#allocation21_spill]] }
  0x59   : > { %s612_s12 = scalar_lea.vmem %s2049_s20, %s1262_s0  ;;  %v614_v4 = vld [vmem:[%s608_s22] sm:$0xff]  ;;  %1330 = vmatpush3.bf16.msra.mxu0 %v1456_v3  ;;  %s604_s0 = scalar_lea.vmem [#allocation7], %s1259_s11 }
  0x5a   : > { %v615_v5 = vld [vmem:[%s612_s12] sm:$0xff]  ;;  %v630_v7 = vpack.c.bf16 %v614_v4, %v614_v4  ;;  %1347 = vmatprep.subr.bf16.mxu0 %v1608_v0  ;;  %1338 = vmatpush3.bf16.msra.mxu1 %v1458_v8  ;;  %v1472_v4 = vld [vmem:[%s2012_s15 + $0x8] sm:$0xff]   ;;  %s2052_s12 = sld [smem:[#allocation20_spill]]  ;;  %s1148_s24 = sshll.u32 %s604_s0, 4  ;;  %s1149_s24 = int_to_ptr.vmem [resolvable:$true] %s1148_s24 }
  0x5b   : > { %620 = vperm.xlu0 %1454, %v615_v5   ;;  %1339 = vmatprep.subr.bf16.mxu1 %v1608_v0  ;;  %v1465_v35 = vld [vmem:[%s2007_s10] sm:$0xff]   ;;  %s2054_s22 = sld [smem:[#allocation22_spill]]  ;;  %s1135_s14 = scalar_lea.sflag [#allocation4], %s1812_s23 }
  0x5c   : > { %1332 = vmatmul.mubr.msk.bf16.vlgmr.msra.gmra.mxu0 %vm647_vm1, %v630_v7  ;;  %v1275_v36 = vld [vmem:[%s2006_s9] ss:$0 sm:$0xff]  ;;  %p2055_p11 = scmp.ne.s32.totalorder %s2042_s17, 0  ;;  %s1614_s11 = smov [#allocation7]  }
  0x5d   : > { %1355 = vmatprep.mubr.msk.bf16.mxu0 %vm1609_vm0, %v1608_v0  ;;  %1348 = vmatpush3.bf16.msra.mxu0 %v1461_v11  ;;  %v616_v47 = vld [vmem:[%s1818_s29] sm:$0xff]  ;;  %s1538_s19 = sshll.u32 %s1614_s11, 4  ;;  %s1539_s19 = int_to_ptr.vmem [resolvable:$false] %s1538_s19 }
  0x5e   : > { %1340 = vmatpush3.bf16.msra.mxu1 %v1459_v9  ;;  %1349 = vmatprep.subr.bf16.mxu0 %v1608_v0  ;;  %v1469_v53 = vld [vmem:[%s2010_s13] sm:$0xff]   ;;  %s1540_s20 = scalar_lea.vmem %s1539_s19, 256  ;;  %p1541_p2 = scmp.lt.s32.totalorder %s1149_s24, %s1539_s19 }
  0x5f   : > { %1341 = vmatprep.subr.bf16.mxu1 %v1608_v0  ;;  %v1281_v56 = vld [vmem:[%s2050_s18] ss:$0 sm:$0xff]  ;;  %s1299_s18 = sshll.u32 %s1726_s28, 7  ;;  %s1534_s28 = scalar_lea.vmem %s1149_s24, 128 }
  0x60   : > { %v1473_v5 = vld [vmem:[%s2012_s15] sm:$0xff]   ;;  %p1535_p3 = scmp.ne.s32.totalorder %s1149_s24, %s1534_s28  ;;  %p1542_p13 = scmp.lt.s32.totalorder %s1540_s20, %s1534_s28 }
  0x61   : > { %1350 = vmatpush3.bf16.msra.mxu0 %v1462_v12  ;;  %v1285_v6 = vld [vmem:[%s2052_s12] ss:$0 sm:$0xff]  ;;  %s1959_s29 = scalar_lea.hbm %s2054_s22, %s1299_s18 }
  0x62   : > { %1342 = vmatpush3.bf16.msra.mxu1 %v1460_v10  ;;  %1351 = vmatprep.subr.bf16.mxu0 %v1608_v0  ;;  %p1536_p7 = pnand %p1535_p3, %p2055_p11  ;;  %p1543_p0 = por %p1542_p13, %p1541_p2 }
  0x63   : > { %1359 = vmatprep.subr.bf16.mxu1 %v1608_v0 }
  0x64   : > { %p1537_p10 = pneg %p1536_p7 }
  0x65   : > { %1352 = vmatpush3.bf16.msra.mxu0 %v1463_v25 }
  0x66   : > { %1353 = vmatprep.subr.bf16.mxu0 %v1608_v0  ;;  %p1544_p5 = pnand %p1543_p0, %p1537_p10 }
  0x69   : > { %1354 = vmatpush3.bf16.msra.mxu0 %v1464_v26 }
  0x6a   : > { %1365 = vmatprep.subr.bf16.mxu0 %v1608_v0 }
  0xd6   : > { %v1874_v14 = vpop.permute.xlu0 %620 }
  0xd7   : > { %v629_v15 = vmul.f32 %v1264_v13, %v1874_v14  ;;  %v884_v57 = vmul.f32 %v1281_v56, %v1874_v14 }
 0x11c   : > { %v685_v16 = vpop.f32.mrf.mxu0 }
 0x11d   : > { %v686_v18 = vadd.f32 %v685_v16, %v629_v15 }
 0x11e   : > { %v1333_v19 = vpop.f32.mrf.mxu0 }
 0x11f   : > { %v698_v20 = vadd.f32 %v1268_v17, %v686_v18 }
 0x120   : > { %v688_v21 = vpop.f32.mrf.mxu0 }
 0x121   : > { %v699_v22 = vmax.f32 %v698_v20, 0.0 }
 0x122   : > { %v1334_v23 = vpop.f32.mrf.mxu0 }
 0x123   : > { %v700_v24 = vpack.c.bf16 %v699_v22, %v699_v22 }
 0x125   : > { %1344 = vmatmul.mubr.msk.bf16.vlgmr.msra.gmra.mxu1 %vm740_vm2, %v700_v24 }
 0x126   : > { %1361 = vmatprep.mubr.msk.bf16.mxu1 %vm1609_vm0, %v1608_v0  ;;  %1360 = vmatpush3.bf16.msra.mxu1 %v1465_v35 }
 0x127   : > { %1377 = vmatprep.subr.bf16.mxu1 %v1608_v0 }
 0x1e5   : > { %v778_v28 = vpop.f32.mrf.mxu1 }
 0x1e6   : > { %v779_v29 = vadd.f32 %v1269_v27, %v778_v28 }
 0x1e7   : > { %v1345_v30 = vpop.f32.mrf.mxu1 }
 0x1e8   : > { %v784_v31 = vmax.f32 %v779_v29, 0.0 }
 0x1e9   : > { %v781_v32 = vpop.f32.mrf.mxu1 }
 0x1ea   : > { %v785_v33 = vpack.c.bf16 %v784_v31, %v784_v31 }
 0x1eb   : > { %v1346_v34 = vpop.f32.mrf.mxu1 }
 0x1ec   : > { %1356 = vmatmul.mubr.msk.bf16.vlgmr.msra.gmra.mxu0 %vm740_vm2, %v785_v33 }
 0x1ed   : > { %1373 = vmatprep.mubr.msk.bf16.mxu0 %vm1609_vm0, %v1608_v0  ;;  %1366 = vmatpush3.bf16.msra.mxu0 %v1466_v45 }
 0x1ee   : > { %1367 = vmatprep.subr.bf16.mxu0 %v1608_v0 }
 0x1f1   : > { %1368 = vmatpush3.bf16.msra.mxu0 %v1467_v46 }
 0x1f2   : > { %1369 = vmatprep.subr.bf16.mxu0 %v1608_v0 }
 0x1f5   : > { %1370 = vmatpush3.bf16.msra.mxu0 %v1468_v52 }
 0x1f6   : > { %1371 = vmatprep.subr.bf16.mxu0 %v1608_v0 }
 0x1f9   : > { %1372 = vmatpush3.bf16.msra.mxu0 %v1469_v53 }
 0x2ac   : > { %v862_v37 = vpop.f32.mrf.mxu0 }
 0x2ad   : > { %v863_v38 = vadd.f32 %v1275_v36, %v862_v37 }
 0x2ae   : > { %v1357_v39 = vpop.f32.mrf.mxu0 }
 0x2af   : > { %v868_v40 = vmul.f32 0.5, %v863_v38  ;;  %1121 = vrot.lane.b32.xlu1 %v863_v38, %s1611_s30 }
 0x2b0   : > { %v865_v41 = vpop.f32.mrf.mxu0 }
 0x2b1   : > { %v869_v42 = vmul.f32 1.442695, %v868_v40 }
 0x2b2   : > { %v1358_v43 = vpop.f32.mrf.mxu0 }
 0x2b3   : > { %1474 = vpow2.f32 %v869_v42 }
 0x2c0   : > { %v1475_v44 = vpop.eup %1474 }
 0x2c1   : > { %872 = vrot.lane.b32.xlu0 %v1475_v44, %s1612_s16 }
 0x321   : > { %v1122_v22 = vpop.permute.xlu1 %1121 }
 0x333   : > { %v873_v48 = vpop.permute.xlu0 %872 }
 0x334   : > { %v875_v49 = vmul.f32 %v873_v48, %v616_v47 }
 0x336   : > { %v876_v50 = vadd.f32 %v875_v49, %v863_v38 }
 0x338   : > { %v885_v51 = vpack.c.bf16 %v876_v50, %v876_v50  ;;  %1125 = vrot.lane.b32.xlu1 %v876_v50, %s1613_s1  ;;  %s2051_s1 = sld [smem:[#allocation19_spill]] }
 0x33a   : > { %1362 = vmatmul.mubr.msk.bf16.vlgmr.msra.gmra.mxu1 %vm894_vm3, %v885_v51 }
 0x33b   : > { %1385 = vmatprep.mubr.msk.bf16.mxu1 %vm1609_vm0, %v1608_v0  ;;  %1378 = vmatpush3.bf16.msra.mxu1 %v1470_v54 }
 0x33c   : > { %1379 = vmatprep.subr.bf16.mxu1 %v1608_v0 }
 0x33e   : > { %v1284_v59 = vld [vmem:[%s2051_s1] ss:$0 sm:$0xff] }
 0x33f   : > { %1380 = vmatpush3.bf16.msra.mxu1 %v1471_v55 }
 0x340   : > { %1381 = vmatprep.subr.bf16.mxu1 %v1608_v0 }
 0x343   : > { %1382 = vmatpush3.bf16.msra.mxu1 %v1472_v4 }
 0x344   : > { %1383 = vmatprep.subr.bf16.mxu1 %v1608_v0  ;;  %v1291_v0 = vld [vmem:[%s2053_s3] ss:$0 sm:$0xff] }
 0x347   : > { %1384 = vmatpush3.bf16.msra.mxu1 %v1473_v5 }
 0x3aa   : > { %v1126_v25 = vpop.permute.xlu1 %1125 }
 0x3fa   : > { %v932_v58 = vpop.f32.mrf.mxu1 }
 0x3fb   : > { %v933_v60 = vadd.f32 %v932_v58, %v884_v57 }
 0x3fc   : > { %v1363_v61 = vpop.f32.mrf.mxu1 }
 0x3fd   : > { %v945_v62 = vadd.f32 %v1284_v59, %v933_v60 }
 0x3fe   : > { %v935_v63 = vpop.f32.mrf.mxu1 }
 0x3ff   : > { %v946_v1 = vmax.f32 %v945_v62, 0.0 }
 0x400   : > { %v1364_v2 = vpop.f32.mrf.mxu1 }
 0x401   : > { %v947_v3 = vpack.c.bf16 %v946_v1, %v946_v1 }
 0x403   : > { %1374 = vmatmul.mubr.msk.bf16.vlgmr.msra.gmra.mxu0 %vm740_vm2, %v947_v3 }
 0x4c3   : > { %v1024_v7 = vpop.f32.mrf.mxu0 }
 0x4c4   : > { %v1025_v8 = vadd.f32 %v1285_v6, %v1024_v7 }
 0x4c5   : > { %v1375_v9 = vpop.f32.mrf.mxu0 }
 0x4c6   : > { %v1030_v10 = vmax.f32 %v1025_v8, 0.0 }
 0x4c7   : > { %v1027_v11 = vpop.f32.mrf.mxu0 }
 0x4c8   : > { %v1031_v12 = vpack.c.bf16 %v1030_v10, %v1030_v10 }
 0x4c9   : > { %v1376_v13 = vpop.f32.mrf.mxu0 }
 0x4ca   : > { %1386 = vmatmul.mubr.msk.bf16.vlgmr.msra.gmra.mxu1 %vm740_vm2, %v1031_v12 }
 0x58a   : > { %v1108_v14 = vpop.f32.mrf.mxu1 }
 0x58b   : > { %v1109_v15 = vadd.f32 %v1291_v0, %v1108_v14 }
 0x58c   : > { %v1387_v16 = vpop.f32.mrf.mxu1 }
 0x58d   : > { %v1297_v17 = vmul.f32 -1.442695, %v1109_v15 }
 0x58e   : > { %v1111_v18 = vpop.f32.mrf.mxu1 }
 0x58f   : > { %1476 = vpow2.f32 %v1297_v17 }
 0x590   : > { %v1388_v19 = vpop.f32.mrf.mxu1 }
 0x59c   : > { %v1477_v20 = vpop.eup %1476 }
 0x59d   : > { %v1117_v21 = vadd.f32 1.0, %v1477_v20 }
 0x59f   : > { %1478 = vrcp.f32 %v1117_v21 }
 0x5ac   : > { %v1479_v23 = vpop.eup %1478 }
 0x5ad   : > { %v1128_v24 = vsel %vm647_vm1, %v1479_v23, %v1122_v22 }
 0x5ae   : > { %v1130_v26 = vsel %vm1129_vm4, %v1128_v24, %v1122_v22 }
 0x5af   : > { %v1131_v27 = vsel %vm740_vm2, %v1130_v26, %v1126_v25 }
 0x5b0   : > { %1133 = vst.msk [vmem:[%s604_s0] sm:$0xff] %vm1132_vm5, %v1131_v27 }
 0x5b1   : > { %1547 = shalt.err (!%p1544_p5)
}
 0x5b2   : > { %s1548_s12 = scalar_lea.hbm %s1959_s29, 128  ;;  %s1552_s16 = scalar_lea.hbm %s2054_s22, 256 }
 0x5b3   : > { %p1549_p9 = scmp.ne.s32.totalorder %s1959_s29, %s1548_s12  ;;  %p1553_p4 = scmp.lt.s32.totalorder %s1959_s29, %s2054_s22 }
 0x5b4   : > { %p1554_p6 = scmp.lt.s32.totalorder %s1552_s16, %s1548_s12 }
 0x5b5   : > { %p1550_p12 = pnand %p1549_p9, %p2055_p11 }
 0x5b6   : > { %p1555_p8 = por %p1554_p6, %p1553_p4 }
 0x5b7   : > { %p1551_p1 = pneg %p1550_p12 }
 0x5b9   : > { %p1556_p3 = pnand %p1555_p8, %p1551_p1 }
 0x5bb   : > { %1559 = shalt.err (!%p1556_p3)
}
 0x5bc   : > { %1395 = dma.vmem_to_hbm [thread:$0]  (%p2055_p11), %s1149_s24, 128, %s1959_s29, %s1135_s14  }
 0x5bd PF: > { %s2056_s0 = sld [smem:[#allocation11_spill]]  ;;  %p2059_p10 = scmp.ge.s32.totalorder %s1602_s27, 2 }
 0x5be   : > { %s2057_s1 = sld [smem:[#allocation12_spill]] }
 0x5c3   : > { %s1160_s21 = sand.u32 1, %s2056_s0  }
 0x5c4   : > { %p2058_p7 = scmp.ne.s32.totalorder %s2057_s1, 0  ;;  %s1161_s28 = scalar_lea.sflag [#allocation4], %s1160_s21 }
 0x5c6   : > { %p1406_p2 = pnand %p2059_p10, %p2058_p7 }
 0x5c8   : > { %p1407_p13 = pneg %p1406_p2 }
 0x5ca   : > { %1585 = dma.done.wait (%p1407_p13), %s1161_s28, 128  }
 0x5cb   : > { %1587 = vsyncadd (%p1407_p13), %s1161_s28, 4294967168  ;;  %s2060_s27 = sld [smem:[#allocation13_spill]]  ;;  %s2062_s24 = smov %s1594_s25 }
 0x5cc   : > { %s2061_s11 = sld [smem:[#allocation14_spill]]  ;;  %s2063_s25 = smov %s1598_s26 }
 0x5d1   : > { %p31_p0 = scmp.ge.s32.totalorder %s2060_s27, 4  }
 0x5d2   : > { %s2064_s26 = smov %s2061_s11 }
 0x5d3   :  { %33 = sbr.rel (!%p31_p0) target bundleno = 15 (0xf), region = 143 }
 0x5d8   :  { %1166 = vsyncpa [#allocation3], 1 }
 0x5d9   :  { %1168 = vsyncpa [#allocation3 + $0x1], 1 }
 0x5da   :  { %1169 = vsyncpa [#allocation6], 1 }
 0x5db   :  { %1170 = vsyncpa [#allocation4], 1 }
 0x5dc   :  { %1172 = vsyncpa [#allocation4 + $0x1], 1 }

</bundles_post_ra>
